<compile_context>
chip_gen: v7x
topology: tpu7x:2x2x1
jax: 0.10.0
libtpu: 0.0.40
codegen_flags: <defaults>
</compile_context>

<pallas_src>
import functools
import math

import jax
import jax.numpy as jnp
from jax import lax
from jax.experimental import pallas as pl
from jax.experimental.pallas import tpu as pltpu


# Fits under v7x's 64 MiB physical VMEM with headroom; raises the scoped
# default on v5e/v6e.  Actual working set at production shapes is ~24 MiB.
_VMEM_LIMIT_BYTES = 48 * 1024 * 1024


def _choose_tile(s: int, cap: int) -> int:
    """Largest divisor of s that is <= cap and a multiple of 128, else s.

    Tiles are used as lane dims of (C, tile) blocks, so they must be 128-
    aligned (or equal to the full sequence length S).
    """
    t = (min(cap, s) // 128) * 128
    while t >= 128:
        if s % t == 0:
            return t
        t -= 128
    return s


# ---------------------------------------------------------------------------
# Pass 1: K/V projection only (Q is fused into pass 2).  x arrives as a
# (C, TS) block of the NCHW-derived (B, C, S) view; the contraction over C is
# expressed with dot_general so no transpose is materialized.
# ---------------------------------------------------------------------------
def _kv_proj_kernel(x_ref, wk_ref, wv_ref, bk_ref, bv_ref, k_ref, v_ref):
    xb = x_ref[...].astype(jnp.bfloat16)                           # (C, TS)

    k = lax.dot_general(xb, wk_ref[...],
                        dimension_numbers=(((0,), (0,)), ((), ())),
                        preferred_element_type=jnp.float32)        # (TS, C)
    k_ref[...] = (k + bk_ref[...]).astype(k_ref.dtype)

    v = lax.dot_general(xb, wv_ref[...],
                        dimension_numbers=(((0,), (0,)), ((), ())),
                        preferred_element_type=jnp.float32)        # (TS, C)
    v_ref[...] = (v + bv_ref[...]).astype(v_ref.dtype)


# ---------------------------------------------------------------------------
# Pass 2: fused Q projection + flash attention (online softmax) + out_proj +
# bias + residual.  K/V are VMEM-resident per batch (full (S, C) blocks);
# the kv axis is the innermost "arbitrary" grid dim.  The output tile is
# produced transposed, (C, TQ), so the result is already in (B, C, S) layout.
# ---------------------------------------------------------------------------
def _flash_attn_kernel(x_ref, k_ref, v_ref, wq_ref, bq_ref, wout_ref, bout_ref,
                       o_ref, q_sc, m_sc, l_sc, acc_sc, *, tk, use_bf16_exp):
    ki = pl.program_id(2)

    @pl.when(ki == 0)
    def _():
        # Fused Q projection from the residual x tile already in VMEM.
        c_in = x_ref.shape[0]
        scale = jnp.float32(1.0 / math.sqrt(c_in))
        xb = x_ref[...].astype(jnp.bfloat16)                       # (C, TQ)
        q = lax.dot_general(xb, wq_ref[...],
                            dimension_numbers=(((0,), (0,)), ((), ())),
                            preferred_element_type=jnp.float32)    # (TQ, C)
        q_sc[...] = ((q + bq_ref[...]) * scale).astype(q_sc.dtype)
        m_sc[...] = jnp.full_like(m_sc, -jnp.inf)
        l_sc[...] = jnp.zeros_like(l_sc)
        acc_sc[...] = jnp.zeros_like(acc_sc)

    start = pl.multiple_of(ki * tk, tk)
    k_blk = k_ref[pl.ds(start, tk), :]                             # (TK, C) bf16
    v_blk = v_ref[pl.ds(start, tk), :]                             # (TK, C) bf16

    # scores (TQ, TK): contract along C of both q and k (no k.T relayout).
    s = lax.dot_general(q_sc[...], k_blk,
                        dimension_numbers=(((1,), (1,)), ((), ())),
                        preferred_element_type=jnp.float32)

    m_prev = m_sc[...]
    m_new = jnp.maximum(m_prev, jnp.max(s, axis=-1, keepdims=True))
    alpha = jnp.exp(m_prev - m_new)

    if use_bf16_exp:
        # v6e/v7x only: EUP has a bf16 path (~2x on the exp slot).  p is cast
        # to bf16 for the PV matmul anyway; keep m/l/alpha/row-sum in f32.
        p = jnp.exp((s - m_new).astype(jnp.bfloat16))
        row_sum = jnp.sum(p.astype(jnp.float32), axis=-1, keepdims=True)
        pv = jnp.dot(p, v_blk, preferred_element_type=jnp.float32)
    else:
        p = jnp.exp(s - m_new)
        row_sum = jnp.sum(p, axis=-1, keepdims=True)
        pv = jnp.dot(p.astype(jnp.bfloat16), v_blk,
                     preferred_element_type=jnp.float32)

    l_sc[...] = alpha * l_sc[...] + row_sum
    acc_sc[...] = alpha * acc_sc[...] + pv
    m_sc[...] = m_new

    @pl.when(ki == pl.num_programs(2) - 1)
    def _():
        attn = acc_sc[...] * pl.reciprocal(l_sc[...], approx=True)  # (TQ, C)
        # out^T = Wout^T @ attn^T -> (C_out, TQ): write directly in the
        # (B, C, S) output layout, so the wrapper never transposes.
        out_ct = lax.dot_general(wout_ref[...], attn.astype(wout_ref.dtype),
                                 dimension_numbers=(((0,), (1,)), ((), ())),
                                 preferred_element_type=jnp.float32)
        out_ct = out_ct + bout_ref[...] + x_ref[...]
        o_ref[...] = out_ct.astype(o_ref.dtype)


# ---------------------------------------------------------------------------
# Wrapper
# ---------------------------------------------------------------------------
def vae_attention_block(x_nchw, w_qkv, b_qkv, w_out, b_out,
                        *, ts_cap=512, tq_cap=512, tk_cap=256,
                        use_bf16_exp=False):
    """x_nchw: (B, C, H, W) float32.  w_qkv: (C, 3C), w_out: (C, C) (in, out)."""
    B, C, H, W = x_nchw.shape
    S = H * W

    # Free reshape only — the NCHW <-> (B,S,C) transposes live in the kernels.
    x_bcs = x_nchw.reshape(B, C, S)

    # Split the fused in_proj; cast weights to bf16 (f32 accumulation stays
    # in-kernel).  Weights are (in, out) so kernels compute y = x @ W + b.
    w_q = w_qkv[:, 0 * C:1 * C].astype(jnp.bfloat16)
    w_k = w_qkv[:, 1 * C:2 * C].astype(jnp.bfloat16)
    w_v = w_qkv[:, 2 * C:3 * C].astype(jnp.bfloat16)
    b_q = b_qkv[0 * C:1 * C].reshape(1, C)
    b_k = b_qkv[1 * C:2 * C].reshape(1, C)
    b_v = b_qkv[2 * C:3 * C].reshape(1, C)
    w_o = w_out.astype(jnp.bfloat16)
    b_o = b_out.reshape(C, 1)   # column bias: broadcasts over the TQ lane dim

    TS = _choose_tile(S, ts_cap)
    TQ = _choose_tile(S, tq_cap)
    TK = _choose_tile(S, tk_cap)

    # ---- pass 1: K/V projection --------------------------------------------
    k, v = pl.pallas_call(
        _kv_proj_kernel,
        out_shape=(jax.ShapeDtypeStruct((B, S, C), jnp.bfloat16),
                   jax.ShapeDtypeStruct((B, S, C), jnp.bfloat16)),
        grid_spec=pltpu.PrefetchScalarGridSpec(
            num_scalar_prefetch=0,
            grid=(B, S // TS),
            in_specs=[
                pl.BlockSpec((pl.Squeezed(), C, TS), lambda b, si: (b, 0, si)),
                pl.BlockSpec((C, C), lambda b, si: (0, 0)),          # W_k
                pl.BlockSpec((C, C), lambda b, si: (0, 0)),          # W_v
                pl.BlockSpec((1, C), lambda b, si: (0, 0)),          # b_k
                pl.BlockSpec((1, C), lambda b, si: (0, 0)),          # b_v
            ],
            out_specs=[
                pl.BlockSpec((pl.Squeezed(), TS, C), lambda b, si: (b, si, 0)),
                pl.BlockSpec((pl.Squeezed(), TS, C), lambda b, si: (b, si, 0)),
            ],
        ),
        compiler_params=pltpu.CompilerParams(
            dimension_semantics=("parallel", "parallel"),
            vmem_limit_bytes=_VMEM_LIMIT_BYTES,
        ),
    )(x_bcs, w_k, w_v, b_k, b_v)

    # ---- pass 2: fused Q proj + flash attention + out_proj + residual ------
    kernel = functools.partial(_flash_attn_kernel, tk=TK,
                               use_bf16_exp=use_bf16_exp)
    out_bcs = pl.pallas_call(
        kernel,
        out_shape=jax.ShapeDtypeStruct((B, C, S), x_nchw.dtype),
        grid_spec=pltpu.PrefetchScalarGridSpec(
            num_scalar_prefetch=0,
            grid=(B, S // TQ, S // TK),
            in_specs=[
                # x tile in (C, TQ) layout: q source + residual.
                pl.BlockSpec((pl.Squeezed(), C, TQ), lambda b, qi, ki: (b, 0, qi)),
                # K, V: VMEM-resident per batch (index depends only on b).
                pl.BlockSpec((pl.Squeezed(), S, C), lambda b, qi, ki: (b, 0, 0)),
                pl.BlockSpec((pl.Squeezed(), S, C), lambda b, qi, ki: (b, 0, 0)),
                pl.BlockSpec((C, C), lambda b, qi, ki: (0, 0)),       # W_q
                pl.BlockSpec((1, C), lambda b, qi, ki: (0, 0)),       # b_q
                pl.BlockSpec((C, C), lambda b, qi, ki: (0, 0)),       # W_out
                pl.BlockSpec((C, 1), lambda b, qi, ki: (0, 0)),       # b_out
            ],
            out_specs=pl.BlockSpec((pl.Squeezed(), C, TQ),
                                   lambda b, qi, ki: (b, 0, qi)),
            scratch_shapes=[
                pltpu.VMEM((TQ, C), jnp.bfloat16),   # q (per query tile)
                pltpu.VMEM((TQ, 1), jnp.float32),    # running max m
                pltpu.VMEM((TQ, 1), jnp.float32),    # running denom l
                pltpu.VMEM((TQ, C), jnp.float32),    # accumulator
            ],
        ),
        compiler_params=pltpu.CompilerParams(
            # qi kept "parallel" so v7x's two TensorCores split query tiles
            # even when B == 1; kv axis is the sequential reduction.
            dimension_semantics=("parallel", "parallel", "arbitrary"),
            vmem_limit_bytes=_VMEM_LIMIT_BYTES,
        ),
    )(x_bcs, k, v, w_q, b_q, w_o, b_o)

    # Output is already in (B, C, S); just a free reshape back to NCHW.
    return out_bcs.reshape(B, C, H, W)


def _reference(x_nchw, w_qkv, b_qkv, w_out, b_out):
    """Pure-JAX f32 reference mirroring the PyTorch forward."""
    B, C, H, W = x_nchw.shape
    S = H * W
    x = jnp.transpose(x_nchw.reshape(B, C, S), (0, 2, 1))            # (B, S, C)
    qkv = x @ w_qkv + b_qkv                                          # (B, S, 3C)
    q, k, v = qkv[..., :C], qkv[..., C:2 * C], qkv[..., 2 * C:]
    scores = jnp.einsum("bqc,bkc->bqk", q, k) / math.sqrt(C)
    p = jax.nn.softmax(scores, axis=-1)
    attn = jnp.einsum("bqk,bkc->bqc", p, v)
    out = attn @ w_out + b_out + x
    return jnp.transpose(out, (0, 2, 1)).reshape(B, C, H, W)


if __name__ == "__main__":
    # Small shapes consistent with the module: channels divisible by 32
    # (GroupNorm(32, C) in __init__), spatial 8x8 -> seq length 64.
    B, C, H, W = 2, 64, 8, 8

    key = jax.random.PRNGKey(0)
    kx, k1, k2, k3, k4 = jax.random.split(key, 5)

    x = jax.random.normal(kx, (B, C, H, W), dtype=jnp.float32)

    lim = 1.0 / math.sqrt(C)
    w_qkv = jax.random.uniform(k1, (C, 3 * C), jnp.float32, -lim, lim)
    b_qkv = jax.random.uniform(k2, (3 * C,), jnp.float32, -lim, lim)
    w_out = jax.random.uniform(k3, (C, C), jnp.float32, -lim, lim)
    b_out = jax.random.uniform(k4, (C,), jnp.float32, -lim, lim)

    out = vae_attention_block(x, w_qkv, b_qkv, w_out, b_out)
    jax.block_until_ready(out)

    ref = _reference(x, w_qkv, b_qkv, w_out, b_out)
    assert out.shape == (B, C, H, W)
    # bf16 MXU operands + approx EUP reciprocal -> loosened tolerance vs f32 ref.
    max_err = float(jnp.max(jnp.abs(out - ref)))
    assert jnp.allclose(out, ref, atol=3e-2, rtol=3e-2), (
        f"mismatch vs reference, max abs err {max_err}")

    print("KERNEL_OK")
</pallas_src>

<mosaic_0001>
module attributes {stable_mosaic.version = 11 : i64} {
  func.func @_kv_proj_kernel(%arg0: i32, %arg1: i32, %arg2: memref<1x64x64xf32, #tpu.memory_space<vmem>>, %arg3: memref<64x64xbf16, #tpu.memory_space<vmem>>, %arg4: memref<64x64xbf16, #tpu.memory_space<vmem>>, %arg5: memref<1x64xf32, #tpu.memory_space<vmem>>, %arg6: memref<1x64xf32, #tpu.memory_space<vmem>>, %arg7: memref<1x64x64xbf16, #tpu.memory_space<vmem>>, %arg8: memref<1x64x64xbf16, #tpu.memory_space<vmem>>) attributes {dimension_semantics = [#tpu.dimension_semantics<parallel>, #tpu.dimension_semantics<parallel>], iteration_bounds = array<i64: 2, 1>, scalar_prefetch = 0 : i64, scratch_operands = 0 : i64, tpu.core_type = #tpu.core_type<tc>, window_params = [{transform_indices = @transform_0, window_bounds = array<i64: 1, 64, 64>}, {pipeline_mode = #tpu.pipeline_mode<synchronous>, transform_indices = @transform_1, window_bounds = array<i64: 64, 64>}, {pipeline_mode = #tpu.pipeline_mode<synchronous>, transform_indices = @transform_2, window_bounds = array<i64: 64, 64>}, {pipeline_mode = #tpu.pipeline_mode<synchronous>, transform_indices = @transform_3, window_bounds = array<i64: 1, 64>}, {pipeline_mode = #tpu.pipeline_mode<synchronous>, transform_indices = @transform_4, window_bounds = array<i64: 1, 64>}, {transform_indices = @transform_5, window_bounds = array<i64: 1, 64, 64>}, {transform_indices = @transform_6, window_bounds = array<i64: 1, 64, 64>}]} {
    %c0 = arith.constant 0 : index
    %c0_0 = arith.constant 0 : index
    %c0_1 = arith.constant 0 : index
    %0 = vector.load %arg2[%c0, %c0_0, %c0_1] : memref<1x64x64xf32, #tpu.memory_space<vmem>>, vector<1x64x64xf32>
    %1 = vector.shape_cast %0 : vector<1x64x64xf32> to vector<64x64xf32>
    %2 = arith.truncf %1 : vector<64x64xf32> to vector<64x64xbf16>
    %c0_2 = arith.constant 0 : index
    %c0_3 = arith.constant 0 : index
    %3 = vector.load %arg3[%c0_2, %c0_3] : memref<64x64xbf16, #tpu.memory_space<vmem>>, vector<64x64xbf16>
    %cst = arith.constant dense<0.000000e+00> : vector<64x64xf32>
    %4 = tpu.matmul %2, %3, %cst {dimension_numbers = #tpu.dot_dimension_numbers<[0], [0], [1], [1], [0, 1, 1, 1], [], []>} : vector<64x64xbf16>, vector<64x64xbf16>, vector<64x64xf32> -> vector<64x64xf32>
    %c0_4 = arith.constant 0 : index
    %c0_5 = arith.constant 0 : index
    %5 = vector.load %arg5[%c0_4, %c0_5] : memref<1x64xf32, #tpu.memory_space<vmem>>, vector<1x64xf32>
    %6 = vector.broadcast %5 : vector<1x64xf32> to vector<64x64xf32>
    %7 = arith.addf %4, %6 : vector<64x64xf32>
    %8 = arith.truncf %7 : vector<64x64xf32> to vector<64x64xbf16>
    %c0_6 = arith.constant 0 : index
    %c0_7 = arith.constant 0 : index
    %c0_8 = arith.constant 0 : index
    %9 = vector.load %arg7[%c0_6, %c0_7, %c0_8] : memref<1x64x64xbf16, #tpu.memory_space<vmem>>, vector<1x64x64xbf16>
    %10 = vector.shape_cast %9 : vector<1x64x64xbf16> to vector<64x64xbf16>
    %11 = vector.shape_cast %8 : vector<64x64xbf16> to vector<1x64x64xbf16>
    tpu.vector_store %arg7[%c0_6, %c0_7, %c0_8], %11 {strides = array<i32>} : memref<1x64x64xbf16, #tpu.memory_space<vmem>>, vector<1x64x64xbf16>,
    %c0_9 = arith.constant 0 : index
    %c0_10 = arith.constant 0 : index
    %12 = vector.load %arg4[%c0_9, %c0_10] : memref<64x64xbf16, #tpu.memory_space<vmem>>, vector<64x64xbf16>
    %cst_11 = arith.constant dense<0.000000e+00> : vector<64x64xf32>
    %13 = tpu.matmul %2, %12, %cst_11 {dimension_numbers = #tpu.dot_dimension_numbers<[0], [0], [1], [1], [0, 1, 1, 1], [], []>} : vector<64x64xbf16>, vector<64x64xbf16>, vector<64x64xf32> -> vector<64x64xf32>
    %c0_12 = arith.constant 0 : index
    %c0_13 = arith.constant 0 : index
    %14 = vector.load %arg6[%c0_12, %c0_13] : memref<1x64xf32, #tpu.memory_space<vmem>>, vector<1x64xf32>
    %15 = vector.broadcast %14 : vector<1x64xf32> to vector<64x64xf32>
    %16 = arith.addf %13, %15 : vector<64x64xf32>
    %17 = arith.truncf %16 : vector<64x64xf32> to vector<64x64xbf16>
    %c0_14 = arith.constant 0 : index
    %c0_15 = arith.constant 0 : index
    %c0_16 = arith.constant 0 : index
    %18 = vector.load %arg8[%c0_14, %c0_15, %c0_16] : memref<1x64x64xbf16, #tpu.memory_space<vmem>>, vector<1x64x64xbf16>
    %19 = vector.shape_cast %18 : vector<1x64x64xbf16> to vector<64x64xbf16>
    %20 = vector.shape_cast %17 : vector<64x64xbf16> to vector<1x64x64xbf16>
    tpu.vector_store %arg8[%c0_14, %c0_15, %c0_16], %20 {strides = array<i32>} : memref<1x64x64xbf16, #tpu.memory_space<vmem>>, vector<1x64x64xbf16>,
    return
  }
  func.func @transform_0(%arg0: i32, %arg1: i32) -> (i32, i32, i32) {
    %c0_i32 = arith.constant 0 : i32
    %c0_i32_0 = arith.constant 0 : i32
    return %arg0, %c0_i32, %arg1 : i32, i32, i32
  }
  func.func @transform_1(%arg0: i32, %arg1: i32) -> (i32, i32) {
    %c0_i32 = arith.constant 0 : i32
    %c0_i32_0 = arith.constant 0 : i32
    %c0_i32_1 = arith.constant 0 : i32
    return %c0_i32, %c0_i32_0 : i32, i32
  }
  func.func @transform_2(%arg0: i32, %arg1: i32) -> (i32, i32) {
    %c0_i32 = arith.constant 0 : i32
    %c0_i32_0 = arith.constant 0 : i32
    %c0_i32_1 = arith.constant 0 : i32
    return %c0_i32, %c0_i32_0 : i32, i32
  }
  func.func @transform_3(%arg0: i32, %arg1: i32) -> (i32, i32) {
    %c0_i32 = arith.constant 0 : i32
    %c0_i32_0 = arith.constant 0 : i32
    %c0_i32_1 = arith.constant 0 : i32
    return %c0_i32, %c0_i32_0 : i32, i32
  }
  func.func @transform_4(%arg0: i32, %arg1: i32) -> (i32, i32) {
    %c0_i32 = arith.constant 0 : i32
    %c0_i32_0 = arith.constant 0 : i32
    %c0_i32_1 = arith.constant 0 : i32
    return %c0_i32, %c0_i32_0 : i32, i32
  }
  func.func @transform_5(%arg0: i32, %arg1: i32) -> (i32, i32, i32) {
    %c0_i32 = arith.constant 0 : i32
    %c0_i32_0 = arith.constant 0 : i32
    return %arg0, %arg1, %c0_i32 : i32, i32, i32
  }
  func.func @transform_6(%arg0: i32, %arg1: i32) -> (i32, i32, i32) {
    %c0_i32 = arith.constant 0 : i32
    %c0_i32_0 = arith.constant 0 : i32
    return %arg0, %arg1, %c0_i32 : i32, i32, i32
  }
}

</mosaic_0001>

<bundles_post_ra>
// kernel: tpu_custom_call.1
= control target key start
LH: loop header
LB: loop body
LE: loop exit
PB: predicated region body
PF: predicated region fallthrough
CT: control target
= control target key end

     0   :  { %12 = vsyncpa [#allocation3], 0  ;;  %s1661_s0 = inlined_call_operand.hbm [shape: f32[2,64,64], index: 0, kind: input, shape index: {}]   ;;  %s1662_s1 = inlined_call_operand.hbm [shape: bf16[64,64], index: 1, kind: input, shape index: {}]   ;;  %s1663_s2 = inlined_call_operand.hbm [shape: bf16[64,64], index: 2, kind: input, shape index: {}]   ;;  %s1664_s3 = inlined_call_operand.vmem [shape: f32[1,64], index: 3, kind: input, shape index: {}]   ;;  %s1665_s4 = inlined_call_operand.vmem [shape: f32[1,64], index: 4, kind: input, shape index: {}]   ;;  %s1666_s5 = inlined_call_operand.hbm [shape: bf16[2,64,64], index: 5, kind: output, shape index: {0}]   ;;  %s1667_s6 = inlined_call_operand.hbm [shape: bf16[2,64,64], index: 6, kind: output, shape index: {1}]  }
   0x1   :  { %14 = vsyncpa [#allocation3 + $0x1], 0 }
   0x2   :  { %15 = vsyncpa [#allocation6], 0 }
   0x3   :  { %16 = vsyncpa [#allocation4], 0 }
   0x4   :  { %18 = vsyncpa [#allocation4 + $0x1], 0 }
   0x5   :  { %19 = vsyncpa [#allocation10], 0 }
   0x6   :  { %21 = vsyncpa [#allocation10 + $0x1], 0  ;;  %s1320_s21 = smov 0   ;;  %s1322_s22 = smov 0  }
   0x7   :  { %s1324_s23 = smov 0   ;;  %s1326_s24 = smov 0  }
   0x8   :  { %s1328_s25 = smov 0   ;;  %s1330_s26 = smov 0  }
   0x9 LB: > { %s841_s27 = sadd.s32 4294967295, %s1272_s26   ;;  %s842_s28 = sadd.s32 4294967294, %s1272_s26   ;;  %s1272_s26 = sphi %s1330_s26, %s27_s26   ;;  %s1268_s25 = sphi %s1328_s25, %s1692_s25   ;;  %s1264_s24 = sphi %s1326_s24, %s1691_s24   ;;  %s1260_s23 = sphi %s1324_s23, %s1690_s23   ;;  %s1256_s22 = sphi %s1322_s22, %s1689_s22   ;;  %s1252_s21 = sphi %s1320_s21, %s1688_s21  }
   0xa   : > { %p61_p0 = scmp.ne.s32.totalorder %s1256_s22, %s1252_s21  ;;  %p1354_p1 = scmp.eq.s32.totalorder %s841_s27, 0 }
   0xb   : > { %p1358_p2 = scmp.eq.s32.totalorder %s841_s27, 1  ;;  %p177_p3 = scmp.eq.s32.totalorder %s842_s28, 1 }
   0xc   : > { %s1673_s29 = scalar_select %p1354_p1, 1, 0 }
   0xd   : > { %p1364_p4 = por %p1354_p1, %p61_p0  ;;  %p843_p5 = scmp.ge.s32.totalorder %s1272_s26, 1 }
   0xe   : > { %p1369_p6 = por %p177_p3, %p61_p0  ;;  %p212_p7 = scmp.lt.s32.totalorder %s1272_s26, 3 }
   0xf   : > { %s1675_s7 = scalar_select %p1364_p4, 1, 0 }
  0x10   : > { %s1676_s8 = scalar_select %p1369_p6, 1, 0 }
  0x11   : > { %p1374_p8 = pnand %p843_p5, %p212_p7  ;;  %s1274_s10 = smov [#allocation5]  }
  0x12   : > { %1677 = sst [smem:[#allocation15_spill]] %s1676_s8  ;;  %s224_s11 = sshll.u32 %s1274_s10, 4  ;;  %s1378_s11 = int_to_ptr.vmem [resolvable:$true] %s224_s11 }
  0x13   : > { %p979_p9 = pneg %p1374_p8  ;;  %s1275_s13 = smov [#allocation7]  }
  0x14   : > { %s237_s14 = sshll.u32 %s1275_s13, 4  ;;  %s1068_s17 = scalar_lea.hbm %s1662_s1, 512  ;;  %s1389_s14 = int_to_ptr.vmem [resolvable:$true] %s237_s14 }
  0x15   : > { %p1385_p11 = pnand %p979_p9, %p1354_p1  ;;  %p1069_p12 = scmp.ne.s32.totalorder %s1662_s1, %s1068_s17 }
  0x16   : > { %p1075_p5 = scmp.lt.u32.totalorder %s1068_s17, %s1662_s1 }
  0x17   : > { %p1070_p13 = pneg %p1385_p11 }
  0x19   : > { %p1071_p0 = pnand %p1070_p13, %p1069_p12 }
  0x1b   : > { %p1072_p3 = pneg %p1071_p0 }
  0x1d   : > { %p1077_p7 = pnand %p1075_p5, %p1072_p3 }
  0x1f   : > { %1080 = shalt.err (!%p1077_p7)
}
  0x20   : > { %s1081_s28 = scalar_lea.vmem %s1378_s11, 512  ;;  %p1089_p1 = scmp.lt.s32.totalorder %s1378_s11, %s1378_s11 }
  0x21   : > { %p1082_p9 = scmp.ne.s32.totalorder %s1378_s11, %s1081_s28  ;;  %p1090_p12 = scmp.lt.s32.totalorder %s1081_s28, %s1081_s28 }
  0x23   : > { %p1084_p10 = pnand %p1082_p9, %p1070_p13  ;;  %p1091_p0 = por %p1090_p12, %p1089_p1 }
  0x25   : > { %p1085_p6 = pneg %p1084_p10 }
  0x27   : > { %p1092_p4 = pnand %p1091_p0, %p1085_p6 }
  0x29   : > { %1095 = shalt.err (!%p1092_p4)
}
  0x2a   : > { %s1276_s10 = smov 64   ;;  %s1277_s13 = smov 4  }
  0x2b   : > { %982 = dma.hbm_to_vmem [thread:$0]  (!%p1385_p11), %s1662_s1, 512, %s1378_s11, [#allocation6], %s1276_s10, %s1276_s10, %s1277_s13  }
  0x2c   : > { %s1096_s19 = scalar_lea.hbm %s1663_s2, 512 }
  0x2d   : > { %p1097_p1 = scmp.ne.s32.totalorder %s1663_s2, %s1096_s19  ;;  %p1103_p10 = scmp.lt.u32.totalorder %s1096_s19, %s1663_s2 }
  0x2f   : > { %p1099_p4 = pnand %p1097_p1, %p1070_p13 }
  0x31   : > { %p1100_p6 = pneg %p1099_p4 }
  0x33   : > { %p1105_p3 = pnand %p1103_p10, %p1100_p6 }
  0x35   : > { %1108 = shalt.err (!%p1105_p3)
}
  0x36   : > { %s1109_s11 = scalar_lea.vmem %s1389_s14, 512  ;;  %p1117_p12 = scmp.lt.s32.totalorder %s1389_s14, %s1389_s14 }
  0x37   : > { %p1110_p5 = scmp.ne.s32.totalorder %s1389_s14, %s1109_s11  ;;  %p1118_p0 = scmp.lt.s32.totalorder %s1109_s11, %s1109_s11 }
  0x39   : > { %p1112_p7 = pnand %p1110_p5, %p1070_p13  ;;  %p1119_p1 = por %p1118_p0, %p1117_p12 }
  0x3b   : > { %p1113_p9 = pneg %p1112_p7 }
  0x3d   : > { %p1120_p4 = pnand %p1119_p1, %p1113_p9 }
  0x3f   : > { %1123 = shalt.err (!%p1120_p4)
}
  0x40   : > { %985 = dma.hbm_to_vmem [thread:$0]  (!%p1385_p11), %s1663_s2, 512, %s1389_s14, [#allocation6], %s1276_s10, %s1276_s10, %s1277_s13  }
  0x41   : > { %s39_s16 = sadd.s32 1, %s1268_s25  ;;  %s48_s17 = sadd.s32 1, %s1260_s23 }
  0x42   : > { %p41_p13 = scmp.ge.s32.totalorder %s39_s16, 2  ;;  %p55_p6 = scmp.ne.s32.totalorder %s1260_s23, %s1256_s22 }
  0x43   : > { %p56_p10 = scmp.eq.s32.totalorder %s1272_s26, 0  ;;  %p999_p3 = scmp.lt.s32.totalorder %s1272_s26, 2 }
  0x44   : > { %s1694_s16 = smov (%p41_p13, %s39_s16), 0  ;;  %p1453_p7 = por %p1358_p2, %p55_p6 }
  0x45   : > { %p57_p5 = por %p56_p10, %p55_p6  ;;  %s43_s18 = ssub.s32 %s1268_s25, %s1694_s16 }
  0x46   : > { %s1680_s12 = scalar_select %p1453_p7, 1, 0 }
  0x47   : > { %s257_s19 = sand.u32 1, %s1260_s23   ;;  %p46_p9 = scmp.eq.s32.totalorder %s43_s18, 0 }
  0x48   : > { %s847_s14 = sshll.u32 %s257_s19, 6  ;;  %s898_s10 = sshll.u32 %s1268_s25, 10 }
  0x49   : > { %s1462_s13 = scalar_select %p46_p9, %s1260_s23, %s48_s17  }
  0x4a   : > { %s1467_s28 = scalar_lea.hbm %s1661_s0, %s898_s10  ;;  %s261_s30 = scalar_lea.vmem [#allocation2], %s847_s14 }
  0x4b   : > { %s269_s11 = sshll.u32 %s261_s30, 4  ;;  %p1471_p2 = pnand %p999_p3, %p57_p5  ;;  %s1475_s11 = int_to_ptr.vmem [resolvable:$true] %s269_s11 }
  0x4c   : > { %s1477_s15 = scalar_lea.sflag [#allocation3], %s257_s19  ;;  %s1124_s17 = scalar_lea.hbm %s1467_s28, 1024 }
  0x4d   : > { %p1125_p11 = scmp.ne.s32.totalorder %s1467_s28, %s1124_s17  ;;  %p1126_p12 = pneg %p1471_p2 }
  0x4e   : > { %s1129_s10 = scalar_lea.hbm %s1661_s0, 2048  ;;  %p1130_p4 = scmp.lt.u32.totalorder %s1467_s28, %s1661_s0 }
  0x4f   : > { %p1127_p0 = pnand %p1126_p12, %p1125_p11  ;;  %p1131_p13 = scmp.lt.u32.totalorder %s1129_s10, %s1124_s17 }
  0x50   : > { %p1133_p10 = scmp.lt.u32.totalorder %s1124_s17, %s1467_s28 }
  0x51   : > { %p1128_p1 = pneg %p1127_p0  ;;  %p1132_p6 = por %p1131_p13, %p1130_p4 }
  0x53   : > { %p1134_p3 = por %p1133_p10, %p1132_p6 }
  0x55   : > { %p1135_p5 = pnand %p1134_p3, %p1128_p1 }
  0x57   : > { %1138 = shalt.err (!%p1135_p5)
}
  0x58   : > { %s1139_s19 = scalar_lea.vmem %s1475_s11, 1024  ;;  %s1278_s30 = smov [#allocation2]  }
  0x59   : > { %p1140_p9 = scmp.ne.s32.totalorder %s1475_s11, %s1139_s19  ;;  %s1144_s18 = sshll.u32 %s1278_s30, 4  ;;  %s1145_s18 = int_to_ptr.vmem [resolvable:$false] %s1144_s18 }
  0x5a   : > { %s1146_s14 = scalar_lea.vmem %s1145_s18, 2048  ;;  %p1147_p7 = scmp.lt.s32.totalorder %s1475_s11, %s1145_s18 }
  0x5b   : > { %p1142_p11 = pnand %p1140_p9, %p1126_p12  ;;  %p1148_p4 = scmp.lt.s32.totalorder %s1146_s14, %s1139_s19 }
  0x5d   : > { %p1143_p0 = pneg %p1142_p11  ;;  %p1149_p13 = por %p1148_p4, %p1147_p7 }
  0x5f   : > { %p1150_p6 = pnand %p1149_p13, %p1143_p0 }
  0x61   : > { %1153 = shalt.err (!%p1150_p6)
}
  0x62   : > { %s1279_s17 = smov 128   ;;  %s1280_s10 = smov 8  }
  0x63   : > { %989 = dma.hbm_to_vmem [thread:$0]  (!%p1471_p2), %s1467_s28, 1024, %s1475_s11, %s1477_s15, %s1279_s17, %s1279_s17, %s1280_s10  }
  0x64   : > { %281 = sbr.rel (%p1374_p8) target bundleno = 486 (0x1e6), region = 40  ;;  %s1508_s20 = sand.u32 (!%p1374_p8), 1, %s1256_s22  }
  0x65   : > { %s851_s27 = sshll.u32 (!%p1374_p8), %s1508_s20, 6  ;;  %s284_s19 = scalar_lea.sflag (!%p1374_p8), [#allocation3], %s1508_s20 }
  0x66   : > { %s287_s30 = scalar_lea.vmem (!%p1374_p8), [#allocation2], %s851_s27  ;;  %p1682_p7 = scmp.ne.s32.totalorder (!%p1374_p8), %s1675_s7, 0 }
  0x6b   : > { %1235 = dma.done.wait (%p1682_p7), %s284_s19, 1024  }
  0x6c   : > { %1237 = vsyncadd (%p1682_p7), %s284_s19, 4294966272  ;;  %p1683_p12 = scmp.ne.s32.totalorder %s1673_s29, 0 }
  0x6e   : > { %1239 = dma.done.wait (%p1683_p12), [#allocation6], 1024  }
  0x6f   : > { %1241 = vsyncadd (%p1683_p12), [#allocation6], 4294966272  ;;  %v332_v0 = vld [vmem:[%s287_s30] sm:$0xff]  ;;  %v333_v1 = vld [vmem:[%s287_s30 + $0x8] sm:$0xff]  ;;  %vm399_vm0 = vcmask 523264   ;;  %s854_s11 = sshll.u32 %s1508_s20, 5 }
  0x70   : > { %v334_v2 = vld [vmem:[%s287_s30 + $0x10] sm:$0xff]  ;;  %v340_v3 = vpack.c.bf16 %v333_v1, %v332_v0  ;;  %v335_v4 = vld [vmem:[%s287_s30 + $0x18] sm:$0xff]  ;;  %v336_v5 = vld [vmem:[%s287_s30 + $0x20] sm:$0xff]  ;;  %vm509_vm1 = vcmask 519168   ;;  %s1527_s8 = scalar_lea.vmem [#allocation8], %s854_s11  ;;  %s1531_s15 = scalar_lea.vmem [#allocation9], %s854_s11 }
  0x71   : > { %v337_v6 = vld [vmem:[%s287_s30 + $0x28] sm:$0xff]  ;;  %v341_v7 = vpack.c.bf16 %v335_v4, %v334_v2  ;;  %v1060_v8 = vld [vmem:[#allocation5] sm:$0xff]   ;;  %v338_v11 = vld [vmem:[%s287_s30 + $0x30] sm:$0xff]  ;;  %s915_s18 = sshll.u32 %s1264_s24, 9  ;;  %s683_s14 = sshll.u32 %s1527_s8, 4  ;;  %s1561_s14 = int_to_ptr.vmem [resolvable:$true] %s683_s14 }
  0x72   : > { %359 = vxpose.xlu0.c.b16.start [1/4] (short) (narrow) %v340_v3, 64  ;;  %v1061_v9 = vld [vmem:[#allocation7] sm:$0xff]   ;;  %933 = vmatprep.subr.bf16.mxu0 %v1060_v8  ;;  %v1062_v10 = vld [vmem:[#allocation5 + $0x8] sm:$0xff]   ;;  %v339_v12 = vld [vmem:[%s287_s30 + $0x38] sm:$0xff]  ;;  %v342_v14 = vpack.c.bf16 %v337_v6, %v336_v5  ;;  %s1554_s27 = scalar_lea.hbm %s1666_s5, %s915_s18  ;;  %s701_s19 = sshll.u32 %s1531_s15, 4  ;;  %s1578_s19 = int_to_ptr.vmem [resolvable:$true] %s701_s19 }
  0x73   : > { %949 = vmatprep.subr.bf16.mxu1 %v1061_v9  ;;  %934 = vmatpush3.bf16.msra.mxu0 %v1060_v8  ;;  %v1063_v13 = vld [vmem:[#allocation7 + $0x8] sm:$0xff]   ;;  %v1064_v15 = vld [vmem:[#allocation5 + $0x10] sm:$0xff]   ;;  %v343_v17 = vpack.c.bf16 %v339_v12, %v338_v11  ;;  %v1066_v18 = vld [vmem:[#allocation5 + $0x18] sm:$0xff]   ;;  %s1576_s7 = scalar_lea.hbm %s1667_s6, %s915_s18  ;;  %s663_s9 = scalar_lea.sflag [#allocation4], %s1508_s20 }
  0x74   : > { %950 = vmatpush3.bf16.msra.mxu1 %v1061_v9  ;;  %935 = vmatprep.subr.bf16.mxu0 %v1062_v10  ;;  %v1065_v16 = vld [vmem:[#allocation7 + $0x10] sm:$0xff]   ;;  %v1067_v19 = vld [vmem:[#allocation7 + $0x18] sm:$0xff]   ;;  %v856_v24 = vld [vmem:[%s1664_s3] ss:$0 sm:$0xff]  ;;  %s1154_s28 = scalar_lea.vmem %s1561_s14, 512  ;;  %p1684_p2 = scmp.ne.s32.totalorder %s1680_s12, 0 }
  0x75   : > { %951 = vmatprep.subr.bf16.mxu1 %v1063_v13  ;;  %v873_v25 = vld [vmem:[%s1665_s4] ss:$0 sm:$0xff]  ;;  %p1155_p8 = scmp.ne.s32.totalorder %s1561_s14, %s1154_s28  ;;  %s1281_s11 = smov [#allocation8]  }
  0x76   : > { %360 = vxpose.xlu0.c.b16.cont [2/4] (short) (narrow) %v341_v7, 64  ;;  %s1158_s17 = sshll.u32 %s1281_s11, 4  ;;  %s1159_s17 = int_to_ptr.vmem [resolvable:$false] %s1158_s17 }
  0x77   : > { %936 = vmatpush3.bf16.msra.mxu0 %v1062_v10  ;;  %p1156_p1 = pnand %p1155_p8, %p1684_p2  ;;  %s1160_s24 = scalar_lea.vmem %s1159_s17, 1024 }
  0x78   : > { %952 = vmatpush3.bf16.msra.mxu1 %v1063_v13  ;;  %937 = vmatprep.subr.bf16.mxu0 %v1064_v15  ;;  %p1161_p3 = scmp.lt.s32.totalorder %s1561_s14, %s1159_s17  ;;  %p1162_p5 = scmp.lt.s32.totalorder %s1160_s24, %s1154_s28 }
  0x79   : > { %953 = vmatprep.subr.bf16.mxu1 %v1065_v16  ;;  %p1157_p10 = pneg %p1156_p1 }
  0x7a   : > { %361 = vxpose.xlu0.c.b16.cont [3/4] (short) (narrow) %v342_v14, 64  ;;  %p1163_p9 = por %p1162_p5, %p1161_p3 }
  0x7b   : > { %938 = vmatpush3.bf16.msra.mxu0 %v1064_v15 }
  0x7c   : > { %954 = vmatpush3.bf16.msra.mxu1 %v1065_v16  ;;  %939 = vmatprep.subr.bf16.mxu0 %v1066_v18  ;;  %p1164_p11 = pnand %p1163_p9, %p1157_p10 }
  0x7d   : > { %955 = vmatprep.subr.bf16.mxu1 %v1067_v19 }
  0x7e   : > { %362 = vxpose.xlu0.c.b16.end [4/4] (short) (narrow) %v343_v17, 64 }
  0x7f   : > { %940 = vmatpush3.bf16.msra.mxu0 %v1066_v18 }
  0x80   : > { %956 = vmatpush3.bf16.msra.mxu1 %v1067_v19 }
  0xd8   : > { %v367_v20 = vpop.trf.xlu0 }
  0xd9   : > { %941 = vmatprep.mubr.msk.bf16.mxu0 %vm399_vm0, %v367_v20  ;;  %957 = vmatprep.mubr.msk.bf16.mxu1 %vm399_vm0, %v367_v20 }
  0xdc   : > { %v368_v21 = vpop.trf.xlu0 }
  0xdd   : > { %942 = vmatmul.mubr.msk.bf16.vlgmr.msra.gmra.mrb[0].mxu0 %vm399_vm0, %v368_v21  ;;  %958 = vmatmul.mubr.msk.bf16.vlgmr.msra.gmra.mrb[0].mxu1 %vm399_vm0, %v368_v21 }
  0xe0   : > { %v369_v22 = vpop.trf.xlu0 }
  0xe1   : > { %945 = vmatprep.mubr.msk.bf16.mxu0 %vm399_vm0, %v369_v22  ;;  %961 = vmatprep.mubr.msk.bf16.mxu1 %vm399_vm0, %v369_v22 }
  0xe4   : > { %v370_v23 = vpop.trf.xlu0 }
  0xe5   : > { %946 = vmatmul.mubr.msk.bf16.gmra.mrb[4].mxu0 %vm399_vm0, %v370_v23  ;;  %962 = vmatmul.mubr.msk.bf16.gmra.mrb[4].mxu1 %vm399_vm0, %v370_v23 }
 0x1b0   : > { %v943_v26 = vpop.f32.mrb[0].mxu0  ;;  %v959_v27 = vpop.f32.mrb[0].mxu1 }
 0x1b1   : > { %v455_v28 = vadd.f32 %v943_v26, %v856_v24  ;;  %v600_v29 = vadd.f32 %v959_v27, %v873_v25  ;;  %v446_v30 = vpop.f32.mrb[1].mxu0  ;;  %v591_v31 = vpop.f32.mrb[1].mxu1 }
 0x1b2   : > { %v447_v32 = vadd.f32 %v856_v24, %v446_v30  ;;  %v592_v33 = vadd.f32 %v873_v25, %v591_v31  ;;  %v944_v34 = vpop.f32.mrb[2].mxu0  ;;  %v960_v35 = vpop.f32.mrb[2].mxu1 }
 0x1b3   : > { %v901_v36 = vpack.c.bf16 %v455_v28, %v455_v28  ;;  %v909_v37 = vpack.c.bf16 %v600_v29, %v600_v29  ;;  %v458_v38 = vadd.f32 %v944_v34, %v856_v24  ;;  %v603_v39 = vadd.f32 %v960_v35, %v873_v25  ;;  %v449_v40 = vpop.f32.mrb[3].mxu0  ;;  %v594_v41 = vpop.f32.mrb[3].mxu1 }
 0x1b4   : > { %v899_v42 = vpack.c.bf16 %v447_v32, %v447_v32  ;;  %v907_v43 = vpack.c.bf16 %v592_v33, %v592_v33  ;;  %v450_v44 = vadd.f32 %v856_v24, %v449_v40  ;;  %v595_v45 = vadd.f32 %v873_v25, %v594_v41 }
 0x1b5   : > { %512 = vst.msk [vmem:[%s1527_s8 + $0x8] sm:$0xf] %vm509_vm1, %v901_v36  ;;  %656 = vst.msk [vmem:[%s1531_s15 + $0x8] sm:$0xf] %vm509_vm1, %v909_v37  ;;  %v902_v46 = vpack.c.bf16 %v458_v38, %v458_v38  ;;  %v910_v47 = vpack.c.bf16 %v603_v39, %v603_v39 }
 0x1b6   : > { %510 = vst.msk [vmem:[%s1527_s8] sm:$0xf] %vm509_vm1, %v899_v42  ;;  %654 = vst.msk [vmem:[%s1531_s15] sm:$0xf] %vm509_vm1, %v907_v43  ;;  %v900_v48 = vpack.c.bf16 %v450_v44, %v450_v44  ;;  %v908_v49 = vpack.c.bf16 %v595_v45, %v595_v45 }
 0x1b7   : > { %513 = vst.msk [vmem:[%s1527_s8 + $0xc] sm:$0xf] %vm509_vm1, %v902_v46  ;;  %657 = vst.msk [vmem:[%s1531_s15 + $0xc] sm:$0xf] %vm509_vm1, %v910_v47 }
 0x1b8   : > { %511 = vst.msk [vmem:[%s1527_s8 + $0x4] sm:$0xf] %vm509_vm1, %v900_v48  ;;  %655 = vst.msk [vmem:[%s1531_s15 + $0x4] sm:$0xf] %vm509_vm1, %v908_v49  ;;  %v947_v50 = vpop.f32.mrb[4].mxu0  ;;  %v963_v51 = vpop.f32.mrb[4].mxu1 }
 0x1b9   : > { %v471_v52 = vadd.f32 %v947_v50, %v856_v24  ;;  %v616_v53 = vadd.f32 %v963_v51, %v873_v25  ;;  %v462_v54 = vpop.f32.mrb[5].mxu0  ;;  %v607_v55 = vpop.f32.mrb[5].mxu1 }
 0x1ba   : > { %v463_v56 = vadd.f32 %v856_v24, %v462_v54  ;;  %v608_v57 = vadd.f32 %v873_v25, %v607_v55  ;;  %v948_v58 = vpop.f32.mrb[6].mxu0  ;;  %v964_v59 = vpop.f32.mrb[6].mxu1 }
 0x1bb   : > { %v905_v60 = vpack.c.bf16 %v471_v52, %v471_v52  ;;  %v913_v61 = vpack.c.bf16 %v616_v53, %v616_v53  ;;  %v474_v62 = vadd.f32 %v948_v58, %v856_v24  ;;  %v619_v63 = vadd.f32 %v964_v59, %v873_v25  ;;  %v465_v0 = vpop.f32.mrb[7].mxu0  ;;  %v610_v1 = vpop.f32.mrb[7].mxu1 }
 0x1bc   : > { %v903_v2 = vpack.c.bf16 %v463_v56, %v463_v56  ;;  %v911_v3 = vpack.c.bf16 %v608_v57, %v608_v57  ;;  %v466_v4 = vadd.f32 %v856_v24, %v465_v0  ;;  %v611_v5 = vadd.f32 %v873_v25, %v610_v1 }
 0x1bd   : > { %516 = vst.msk [vmem:[%s1527_s8 + $0x18] sm:$0xf] %vm509_vm1, %v905_v60  ;;  %660 = vst.msk [vmem:[%s1531_s15 + $0x18] sm:$0xf] %vm509_vm1, %v913_v61  ;;  %v906_v6 = vpack.c.bf16 %v474_v62, %v474_v62  ;;  %v914_v7 = vpack.c.bf16 %v619_v63, %v619_v63 }
 0x1be   : > { %514 = vst.msk [vmem:[%s1527_s8 + $0x10] sm:$0xf] %vm509_vm1, %v903_v2  ;;  %658 = vst.msk [vmem:[%s1531_s15 + $0x10] sm:$0xf] %vm509_vm1, %v911_v3  ;;  %v904_v8 = vpack.c.bf16 %v466_v4, %v466_v4  ;;  %v912_v9 = vpack.c.bf16 %v611_v5, %v611_v5 }
 0x1bf   : > { %517 = vst.msk [vmem:[%s1527_s8 + $0x1c] sm:$0xf] %vm509_vm1, %v906_v6  ;;  %661 = vst.msk [vmem:[%s1531_s15 + $0x1c] sm:$0xf] %vm509_vm1, %v914_v7 }
 0x1c0   : > { %515 = vst.msk [vmem:[%s1527_s8 + $0x14] sm:$0xf] %vm509_vm1, %v904_v8  ;;  %659 = vst.msk [vmem:[%s1531_s15 + $0x14] sm:$0xf] %vm509_vm1, %v912_v9 }
 0x1c1   : > { %1167 = shalt.err (!%p1164_p11)
}
 0x1c2   : > { %s1168_s8 = scalar_lea.hbm %s1554_s27, 512  ;;  %s1172_s10 = scalar_lea.hbm %s1666_s5, 1024 }
 0x1c3   : > { %p1169_p0 = scmp.ne.s32.totalorder %s1554_s27, %s1168_s8  ;;  %p1173_p6 = scmp.lt.u32.totalorder %s1554_s27, %s1666_s5 }
 0x1c4   : > { %p1174_p7 = scmp.lt.u32.totalorder %s1172_s10, %s1168_s8  ;;  %p1176_p8 = scmp.lt.u32.totalorder %s1168_s8, %s1554_s27 }
 0x1c5   : > { %p1170_p4 = pnand %p1169_p0, %p1684_p2 }
 0x1c6   : > { %p1175_p12 = por %p1174_p7, %p1173_p6 }
 0x1c7   : > { %p1171_p13 = pneg %p1170_p4 }
 0x1c8   : > { %p1177_p1 = por %p1176_p8, %p1175_p12 }
 0x1ca   : > { %p1178_p10 = pnand %p1177_p1, %p1171_p13 }
 0x1cc   : > { %1181 = shalt.err (!%p1178_p10)
}
 0x1cd   : > { %s1282_s28 = smov 64   ;;  %s1283_s11 = smov 4  }
 0x1ce   : > { %975 = dma.vmem_to_hbm [thread:$0]  (%p1684_p2), %s1561_s14, 512, %s1554_s27, %s663_s9, %s1282_s28, %s1282_s28, %s1283_s11  }
 0x1cf   : > { %s668_s17 = scalar_lea.sflag [#allocation10], %s1508_s20  ;;  %s1182_s24 = scalar_lea.vmem %s1578_s19, 512 }
 0x1d0   : > { %p1183_p3 = scmp.ne.s32.totalorder %s1578_s19, %s1182_s24  ;;  %s1284_s8 = smov [#allocation9]  }
 0x1d1   : > { %s1186_s15 = sshll.u32 %s1284_s8, 4  ;;  %s1187_s15 = int_to_ptr.vmem [resolvable:$false] %s1186_s15 }
 0x1d2   : > { %p1184_p5 = pnand %p1183_p3, %p1684_p2  ;;  %s1188_s18 = scalar_lea.vmem %s1187_s15, 1024 }
 0x1d3   : > { %p1189_p11 = scmp.lt.s32.totalorder %s1578_s19, %s1187_s15  ;;  %p1190_p0 = scmp.lt.s32.totalorder %s1188_s18, %s1182_s24 }
 0x1d4   : > { %p1185_p9 = pneg %p1184_p5 }
 0x1d5   : > { %p1191_p4 = por %p1190_p0, %p1189_p11 }
 0x1d7   : > { %p1192_p13 = pnand %p1191_p4, %p1185_p9 }
 0x1d9   : > { %1195 = shalt.err (!%p1192_p13)
}
 0x1da   : > { %s1196_s14 = scalar_lea.hbm %s1576_s7, 512  ;;  %s1200_s10 = scalar_lea.hbm %s1667_s6, 1024 }
 0x1db   : > { %p1197_p6 = scmp.ne.s32.totalorder %s1576_s7, %s1196_s14  ;;  %p1201_p8 = scmp.lt.u32.totalorder %s1576_s7, %s1667_s6 }
 0x1dc   : > { %p1202_p1 = scmp.lt.u32.totalorder %s1200_s10, %s1196_s14  ;;  %p1204_p3 = scmp.lt.u32.totalorder %s1196_s14, %s1576_s7 }
 0x1dd   : > { %p1198_p7 = pnand %p1197_p6, %p1684_p2 }
 0x1de   : > { %p1203_p10 = por %p1202_p1, %p1201_p8 }
 0x1df   : > { %p1199_p12 = pneg %p1198_p7 }
 0x1e0   : > { %p1205_p5 = por %p1204_p3, %p1203_p10 }
 0x1e2   : > { %p1206_p9 = pnand %p1205_p5, %p1199_p12 }
 0x1e4   : > { %1209 = shalt.err (!%p1206_p9)
}
 0x1e5   : > { %976 = dma.vmem_to_hbm [thread:$0]  (%p1684_p2), %s1578_s19, 512, %s1576_s7, %s668_s17, %s1282_s28, %s1282_s28, %s1283_s11  }
 0x1e6 PF: > { %s1685_s24 = sld [smem:[#allocation15_spill]]  ;;  %s716_s8 = sand.u32 1, %s1252_s21  }
 0x1e7   : > { %p1687_p0 = scmp.ge.s32.totalorder %s1272_s26, 2  ;;  %s717_s15 = scalar_lea.sflag [#allocation4], %s716_s8 }
 0x1ec   : > { %p1686_p11 = scmp.ne.s32.totalorder %s1685_s24, 0 }
 0x1ee   : > { %p991_p4 = pnand %p1687_p0, %p1686_p11 }
 0x1f0   : > { %1243 = dma.done.wait (!%p991_p4), %s717_s15, 512  }
 0x1f1   : > { %1245 = vsyncadd (!%p991_p4), %s717_s15, 4294966784  ;;  %s726_s12 = scalar_lea.sflag [#allocation10], %s716_s8 }
 0x1f2   : > { %1247 = dma.done.wait (!%p991_p4), %s726_s12, 512  }
 0x1f3   : > { %1249 = vsyncadd (!%p991_p4), %s726_s12, 4294966784  ;;  %s27_s26 = sadd.s32 1, %s1272_s26   ;;  %s1688_s21 = smov %s1256_s22 }
 0x1f4   : > { %p24_p13 = scmp.ge.s32.totalorder %s27_s26, 4   ;;  %s1689_s22 = smov %s1260_s23 }
 0x1f5   : > { %s1690_s23 = smov %s1462_s13  ;;  %s1691_s24 = smov %s1268_s25 }
 0x1f6   : > { %s1692_s25 = smov %s1694_s16  ;;  %26 = sbr.rel (!%p24_p13) target bundleno = 9 (0x9), region = 110 }
 0x1fd   :  { %731 = vsyncpa [#allocation3], 1 }
 0x1fe   :  { %733 = vsyncpa [#allocation3 + $0x1], 1 }
 0x1ff   :  { %734 = vsyncpa [#allocation6], 1 }
 0x200   :  { %735 = vsyncpa [#allocation4], 1 }
 0x201   :  { %737 = vsyncpa [#allocation4 + $0x1], 1 }
 0x202   :  { %738 = vsyncpa [#allocation10], 1 }
 0x203   :  { %740 = vsyncpa [#allocation10 + $0x1], 1 }

</bundles_post_ra>
